<compile_context>
chip_gen: v5e
topology: v5e:2x2
jax: 0.10.0
libtpu: 0.0.40
codegen_flags: <defaults>
</compile_context>

<pallas_src>
import functools

import numpy as np
import jax
import jax.numpy as jnp
from jax.experimental import pallas as pl
from jax.experimental.pallas import tpu as pltpu


# ----------------------------------------------------------------------------
# Pallas kernel
# ----------------------------------------------------------------------------
def make_h_tanh_kernel(h_max):
    """Elementwise h_tanh: relu6(x+3)*h_max/3 - h_max == clip(x,-3,3)*(h_max/3)."""
    scale = float(h_max) / 3.0

    def kernel(x_ref, o_ref):
        x = x_ref[...]
        o_ref[...] = (jnp.clip(x, -3.0, 3.0) * scale).astype(o_ref.dtype)

    return kernel


# ----------------------------------------------------------------------------
# Tiling heuristics
# ----------------------------------------------------------------------------
def _choose_lanes(n):
    """Largest lane width in {2048..128} dividing n (avoids any padding copy)."""
    for lanes in (2048, 1024, 512, 256, 128):
        if n % lanes == 0:
            return lanes
    return 128  # tiny / odd sizes: pad by < 128 elements


def _choose_rows_block(rows, lanes, itemsize, row_align,
                       target_bytes=2 << 20,   # ~2 MiB blocks: near roofline on
                                               # v6e/v7x, 4x double-buffered =
                                               # 8 MiB < v5e's 16 MiB scoped VMEM
                       min_bytes=1 << 20,      # don't shrink below ~1 MiB just
                                               # to create more grid steps
                       min_blocks=8):          # aim for >=8 steps (v7x megacore
                                               # sharding + pipeline overlap)
    bytes_per_row = lanes * itemsize
    target_rows = max(row_align, target_bytes // bytes_per_row)
    balanced_rows = -(-rows // min_blocks)
    min_rows = max(row_align, min_bytes // bytes_per_row)
    rb = min(target_rows, max(balanced_rows, min_rows))
    rb = max(row_align, (rb // row_align) * row_align)
    if rb >= rows:
        return rows            # single full-extent block (always a legal shape)
    return rb


# ----------------------------------------------------------------------------
# Wrapper
# ----------------------------------------------------------------------------
def h_tanh_forward(x, h_max=1.0):
    """Applies h_tanh elementwise to a tensor of any shape (lane-dense view)."""
    orig_shape = x.shape
    dtype = x.dtype
    itemsize = jnp.dtype(dtype).itemsize
    n = x.size

    lanes = _choose_lanes(n)
    rows = pl.cdiv(n, lanes)
    padded_n = rows * lanes

    flat = x.reshape(-1)                       # free contiguous reshape
    if padded_n != n:                          # rare: only if no lane width divides n
        flat = jnp.pad(flat, (0, padded_n - n))
    x2d = flat.reshape(rows, lanes)

    # Sublane alignment: 8 rows for 32-bit, 16 for bf16, 32 for 8-bit dtypes.
    row_align = max(8, 32 // itemsize)
    rows_block = _choose_rows_block(rows, lanes, itemsize, row_align)
    num_blocks = pl.cdiv(rows, rows_block)     # ragged last block masked by Pallas

    out2d = pl.pallas_call(
        make_h_tanh_kernel(h_max),
        out_shape=jax.ShapeDtypeStruct((rows, lanes), dtype),
        grid=(num_blocks,),
        in_specs=[pl.BlockSpec((rows_block, lanes), lambda i: (i, 0))],
        out_specs=pl.BlockSpec((rows_block, lanes), lambda i: (i, 0)),
        input_output_aliases={0: 0},           # inplace=True semantics
        cost_estimate=pl.CostEstimate(
            flops=3 * padded_n,
            transcendentals=0,
            bytes_accessed=2 * padded_n * itemsize),
        compiler_params=pltpu.CompilerParams(
            dimension_semantics=("parallel",)),
    )(x2d)

    if padded_n != n:
        return out2d.reshape(-1)[:n].reshape(orig_shape)
    return out2d.reshape(orig_shape)


# ----------------------------------------------------------------------------
# Pure-JAX reference (mirrors the PyTorch forward formula exactly)
# ----------------------------------------------------------------------------
def h_tanh_reference(x, h_max=1.0):
    return jnp.clip(x + 3.0, 0.0, 6.0) * (h_max / 3.0) - h_max


# ----------------------------------------------------------------------------
# Main
# ----------------------------------------------------------------------------
if __name__ == "__main__":
    # h_tanh(inplace=True, h_max=1) applied to an NCHW activation tensor.
    B, C, H, W = 2, 4, 16, 16
    h_max = 1.0

    key = jax.random.PRNGKey(0)
    # Scale so values span the full clipping range (< -3, [-3, 3], > 3).
    x = jax.random.normal(key, (B, C, H, W), dtype=jnp.float32) * 3.0

    # Compute the reference first: the kernel call below donates x's buffer
    # (inplace semantics), after which x is no longer readable.
    ref = jax.block_until_ready(h_tanh_reference(x, h_max=h_max))

    fwd = jax.jit(functools.partial(h_tanh_forward, h_max=h_max),
                  donate_argnums=(0,))
    out = jax.block_until_ready(fwd(x))

    assert out.shape == (B, C, H, W)
    assert out.dtype == ref.dtype
    if not np.allclose(np.asarray(out), np.asarray(ref), rtol=1e-6, atol=1e-6):
        raise AssertionError("Pallas h_tanh output mismatch vs reference")

    print("KERNEL_OK")
</pallas_src>

<mosaic_0001>
module attributes {stable_mosaic.version = 11 : i64} {
  func.func @kernel(%arg0: i32, %arg1: memref<1x2048xf32, #tpu.memory_space<vmem>>, %arg2: memref<1x2048xf32, #tpu.memory_space<vmem>>) attributes {dimension_semantics = [#tpu.dimension_semantics<parallel>], iteration_bounds = array<i64: 1>, scalar_prefetch = 0 : i64, scratch_operands = 0 : i64, tpu.core_type = #tpu.core_type<tc>, window_params = [{transform_indices = @transform_0, window_bounds = array<i64: 1, 2048>}, {transform_indices = @transform_1, window_bounds = array<i64: 1, 2048>}]} {
    %c0 = arith.constant 0 : index
    %c0_0 = arith.constant 0 : index
    %0 = vector.load %arg1[%c0, %c0_0] : memref<1x2048xf32, #tpu.memory_space<vmem>>, vector<1x2048xf32>
    %cst = arith.constant -3.000000e+00 : f32
    %cst_1 = arith.constant 3.000000e+00 : f32
    %1 = vector.broadcast %cst : f32 to vector<1x2048xf32>
    %2 = arith.maximumf %1, %0 : vector<1x2048xf32>
    %3 = vector.broadcast %cst_1 : f32 to vector<1x2048xf32>
    %4 = arith.minimumf %3, %2 : vector<1x2048xf32>
    %cst_2 = arith.constant 0.333333343 : f32
    %5 = vector.broadcast %cst_2 : f32 to vector<1x2048xf32>
    %6 = arith.mulf %4, %5 : vector<1x2048xf32>
    %c0_3 = arith.constant 0 : index
    %c0_4 = arith.constant 0 : index
    %7 = vector.load %arg2[%c0_3, %c0_4] : memref<1x2048xf32, #tpu.memory_space<vmem>>, vector<1x2048xf32>
    tpu.vector_store %arg2[%c0_3, %c0_4], %6 {strides = array<i32>} : memref<1x2048xf32, #tpu.memory_space<vmem>>, vector<1x2048xf32>,
    return
  }
  func.func @transform_0(%arg0: i32) -> (i32, i32) {
    %c0_i32 = arith.constant 0 : i32
    %c0_i32_0 = arith.constant 0 : i32
    return %arg0, %c0_i32 : i32, i32
  }
  func.func @transform_1(%arg0: i32) -> (i32, i32) {
    %c0_i32 = arith.constant 0 : i32
    %c0_i32_0 = arith.constant 0 : i32
    return %arg0, %c0_i32 : i32, i32
  }
}

</mosaic_0001>

<bundles_post_ra>
// kernel: h_tanh_forward.1
= control target key start
LH: loop header
LB: loop body
LE: loop exit
PB: predicated region body
PF: predicated region fallthrough
CT: control target
= control target key end

     0   :  { %s46_s0 = inlined_call_operand.vmem [shape: f32[1,2048], index: 0, kind: input, shape index: {}, may-alias: {0,1}]   ;;  %s47_s1 = inlined_call_operand.vmem [shape: f32[1,2048], index: 1, kind: output, shape index: {}, may-alias: {0,1}]  }
   0x1   :  { %v8_v0 = vld [vmem:[%s46_s0] sm:$0xff]  ;;  %v9_v1 = vld [vmem:[%s46_s0 + $0x8] sm:$0xff] }
   0x2   :  { %v22_v2 = vclamps-f32 %v8_v0, 3.0  ;;  %v23_v3 = vclamps-f32 %v9_v1, 3.0 }
   0x4   :  { %v14_v4 = vmul.f32 0.33333334, %v22_v2  ;;  %v15_v5 = vmul.f32 0.33333334, %v23_v3 }
   0x6   :  { %16 = vst [vmem:[%s47_s1] sm:$0xff] %v14_v4 }
   0x7   :  { %17 = vst [vmem:[%s47_s1 + $0x8] sm:$0xff] %v15_v5 }

</bundles_post_ra>
